<compile_context>
chip_gen: v7x
topology: tpu7x:2x2x1
jax: 0.10.0
libtpu: 0.0.40
codegen_flags: <defaults>
</compile_context>

<pallas_src>
import math
import functools

import jax
import jax.numpy as jnp
from jax.experimental import pallas as pl
from jax.experimental.pallas import tpu as pltpu


def _gaussian_taps_1d(sigmas, means, kernel_size, limit=None):
    """Separable 1D Gaussian taps.

    The module's 2D kernel is
        g[c,i,j] = N(c) * exp(-(i-mx)^2/(2 sx^2)) * exp(-(j-my)^2/(2 sy^2)),
    normalized over (i,j). The normalization factorizes exactly, so
        g[c] == gx[c] (outer) gy[c]
    with each 1D factor normalized to sum 1. gx applies along H (conv tap i),
    gy along W (tap j), matching F.conv2d. Returns (gx, gy), each (C_out, K).
    """
    sigmas = sigmas.astype(jnp.float32)
    means = means.astype(jnp.float32)
    if limit is not None:
        # torch: self.sigmas.data[self.sigmas.data < limit] = limit
        sigmas = jnp.maximum(sigmas, jnp.float32(limit))
    K = kernel_size
    coord = jnp.arange(K, dtype=jnp.float32)[None, :]         # (1, K)
    center = (K - 1) / 2.0
    mean_x = center + means[:, 0][:, None]                    # (C_out, 1)
    mean_y = center + means[:, 1][:, None]
    sigma_x = sigmas[:, 0][:, None]
    sigma_y = sigmas[:, 1][:, None]
    gx = jnp.exp(-((coord - mean_x) ** 2) / (2.0 * sigma_x ** 2))
    gy = jnp.exp(-((coord - mean_y) ** 2) / (2.0 * sigma_y ** 2))
    gx = gx / jnp.sum(gx, axis=1, keepdims=True)
    gy = gy / jnp.sum(gy, axis=1, keepdims=True)
    return gx, gy


def _gaussian_kernels_2d(sigmas, means, kernel_size, limit=None):
    """Exact port of LearnableGaussianConv.gaussian_kernels (used only for the
    reference check against XLA's conv)."""
    sigmas = sigmas.astype(jnp.float32)
    means = means.astype(jnp.float32)
    if limit is not None:
        sigmas = jnp.maximum(sigmas, jnp.float32(limit))
    K = kernel_size
    coord = jnp.arange(K, dtype=jnp.float32)
    x_grid, y_grid = jnp.meshgrid(coord, coord, indexing="ij")  # (K, K)
    mean_x = (K - 1) / 2.0 + means[:, 0][:, None, None]
    mean_y = (K - 1) / 2.0 + means[:, 1][:, None, None]
    sigma_x = sigmas[:, 0][:, None, None]
    sigma_y = sigmas[:, 1][:, None, None]
    g = (1.0 / (2.0 * math.pi * sigma_x * sigma_y)) * jnp.exp(
        -(
            (x_grid[None] - mean_x) ** 2 / (2.0 * sigma_x ** 2)
            + (y_grid[None] - mean_y) ** 2 / (2.0 * sigma_y ** 2)
        )
    )
    g = g / jnp.sum(g, axis=(1, 2), keepdims=True)
    return g  # (C_out, K, K)


def _band_matrices(gx, gy, H, W, K):
    """Banded matrices implementing the separable 'same' (zero-padded) conv
    as two MXU matmuls.

    Vertical pass (gx along H):   v_c   = bx_c @ x     with bx_c (H, H),
        bx_c[h, h'] = gx[c, h' - h + pad]  if 0 <= h' - h + pad < K else 0.
    Horizontal pass (gy along W): out_c = v_c @ by_c   with by_c (W, W),
        by_c[w', w] = gy[c, w' - w + pad]  if 0 <= w' - w + pad < K else 0.
    The conv's zero padding is exactly the clipping of the band at the array
    edge (padded inputs are zero, so their taps simply drop out), so no padded
    scratch buffer / halo zeroing / unaligned interior copy is needed.

    Returns bx (C_out*H, H), channel-stacked along rows, and by (C_out, W, W).
    """
    pad = K // 2
    C_out = gx.shape[0]

    h = jnp.arange(H)
    tap_v = h[None, :] - h[:, None] + pad                     # (H, H): h' - h + pad
    valid_v = (tap_v >= 0) & (tap_v < K)
    bx = jnp.where(valid_v[None], gx[:, jnp.clip(tap_v, 0, K - 1)], 0.0)
    bx = bx.reshape(C_out * H, H).astype(jnp.float32)

    w = jnp.arange(W)
    tap_h = w[:, None] - w[None, :] + pad                     # (W, W): w' - w + pad
    valid_h = (tap_h >= 0) & (tap_h < K)
    by = jnp.where(valid_h[None], gy[:, jnp.clip(tap_h, 0, K - 1)], 0.0)
    by = by.astype(jnp.float32)                               # (C_out, W, W)
    return bx, by


def _sep_conv_mxu_kernel(bx_ref, by_ref, x_ref, o_ref, *, H, W, C_out):
    # bx_ref : VMEM (C_out*H, H) f32 — stacked vertical band matrices (resident).
    # by_ref : VMEM (C_out, W, W) f32 — horizontal band matrices (resident).
    # x_ref  : VMEM (H, W)            — one batch element, single input channel.
    # o_ref  : VMEM (C_out, H, W)     — all output channels for this element.
    x = x_ref[...].astype(jnp.float32)

    # Vertical (H) pass for ALL channels in one MXU matmul:
    #   v[c*H + h, w] = sum_i gx[c, i] * x[h + i - pad, w]
    v = jnp.dot(
        bx_ref[...], x,
        precision=jax.lax.Precision.HIGHEST,
        preferred_element_type=jnp.float32,
    )  # (C_out*H, W)

    # Horizontal (W) pass per channel (sublane-aligned static slices of v):
    #   out[c, h, w] = sum_j v[c, h, w + j - pad] * gy[c, j]
    for c in range(C_out):
        vc = v[c * H:(c + 1) * H, :]                          # (H, W)
        o_ref[c] = jnp.dot(
            vc, by_ref[c],
            precision=jax.lax.Precision.HIGHEST,
            preferred_element_type=jnp.float32,
        ).astype(o_ref.dtype)


def _vmem_limit_bytes(H, W, C_out):
    f = 4  # float32
    bands = (C_out * H * H + C_out * W * W) * f        # VMEM-resident band matrices
    io = 2 * (H * W + C_out * H * W) * f               # double-buffered image/output blocks
    live = (C_out * H * W + 2 * H * W + W * W) * f     # v intermediate + x/result + by[c] load
    est = int((2 * bands + io + live) * 1.25) + (1 << 20)
    return max(8 << 20, min(est, 64 << 20))


def learnable_gaussian_conv(x, sigmas, means, kernel_size=9, limit=None):
    """Forward pass of LearnableGaussianConv. x: (N, 1, H, W), NCHW."""
    N, c_in, H, W = x.shape
    assert c_in == 1, "module's conv weight has C_in == 1 (per-channel Gaussian)"
    K = kernel_size

    gx, gy = _gaussian_taps_1d(sigmas, means, K, limit)       # (C_out, K) each
    C_out = gx.shape[0]
    bx, by = _band_matrices(gx, gy, H, W, K)                  # (C_out*H, H), (C_out, W, W)

    kern = functools.partial(_sep_conv_mxu_kernel, H=H, W=W, C_out=C_out)

    out = pl.pallas_call(
        kern,
        out_shape=jax.ShapeDtypeStruct((N, C_out, H, W), x.dtype),
        grid_spec=pltpu.PrefetchScalarGridSpec(
            num_scalar_prefetch=0,
            grid=(N,),
            in_specs=[
                # Band matrices: constant index_map -> fetched once, VMEM-resident.
                pl.BlockSpec((C_out * H, H), lambda n: (0, 0)),
                pl.BlockSpec((C_out, W, W), lambda n: (0, 0, 0)),
                # One unpadded single-channel image per grid step (N, C squeezed).
                pl.BlockSpec((None, None, H, W), lambda n: (n, 0, 0, 0)),
            ],
            # All C_out channels of one batch element per grid step.
            out_specs=pl.BlockSpec((None, C_out, H, W), lambda n: (n, 0, 0, 0)),
        ),
        compiler_params=pltpu.CompilerParams(
            # Single batch axis, no cross-step state -> shardable across
            # TensorCores on v7x; harmless on v5e/v6e.
            dimension_semantics=("parallel",),
            vmem_limit_bytes=_vmem_limit_bytes(H, W, C_out),
        ),
    )(bx, by, x)
    return out


if __name__ == "__main__":
    # Small shapes consistent with the module: in_channels must be 1.
    N, C_IN, H, W = 2, 1, 16, 16
    C_OUT = 4
    K = 9

    key = jax.random.PRNGKey(0)
    x = jax.random.normal(key, (N, C_IN, H, W), dtype=jnp.float32)

    # Deterministic parameter init. __init__ default is sigma=[1,1], mean=[0,0]
    # replicated per out_channel; perturb per-channel deterministically so each
    # output channel uses a distinct Gaussian.
    c = jnp.arange(C_OUT, dtype=jnp.float32)
    sigmas = jnp.stack([1.0 + 0.25 * c, 1.0 + 0.10 * c], axis=1)   # (C_OUT, 2)
    means = jnp.stack([0.20 * c - 0.30, 0.10 - 0.15 * c], axis=1)  # (C_OUT, 2)

    out = learnable_gaussian_conv(x, sigmas, means, kernel_size=K, limit=None)
    out = jax.block_until_ready(out)
    assert out.shape == (N, C_OUT, H, W)

    # Reference check: the module's full 2D kernel + XLA conv (F.conv2d
    # semantics), at HIGHEST precision so both sides are near-true-f32.
    kernels2d = _gaussian_kernels_2d(sigmas, means, K, None)
    ref = jax.lax.conv_general_dilated(
        x,
        kernels2d[:, None, :, :],
        window_strides=(1, 1),
        padding=[(K // 2, K // 2), (K // 2, K // 2)],
        dimension_numbers=("NCHW", "OIHW", "NCHW"),
        precision=jax.lax.Precision.HIGHEST,
    )
    assert jnp.allclose(out, ref, atol=1e-4, rtol=1e-4), "mismatch vs XLA conv reference"

    print("KERNEL_OK")
</pallas_src>

<mosaic_0001>
module attributes {stable_mosaic.version = 11 : i64} {
  func.func @_sep_conv_mxu_kernel(%arg0: i32, %arg1: memref<64x16xf32, #tpu.memory_space<vmem>>, %arg2: memref<4x16x16xf32, #tpu.memory_space<vmem>>, %arg3: memref<1x1x16x16xf32, #tpu.memory_space<vmem>>, %arg4: memref<1x4x16x16xf32, #tpu.memory_space<vmem>>) attributes {dimension_semantics = [#tpu.dimension_semantics<parallel>], iteration_bounds = array<i64: 2>, scalar_prefetch = 0 : i64, scratch_operands = 0 : i64, tpu.core_type = #tpu.core_type<tc>, window_params = [{pipeline_mode = #tpu.pipeline_mode<synchronous>, transform_indices = @transform_0, window_bounds = array<i64: 64, 16>}, {pipeline_mode = #tpu.pipeline_mode<synchronous>, transform_indices = @transform_1, window_bounds = array<i64: 4, 16, 16>}, {transform_indices = @transform_2, window_bounds = array<i64: 1, 1, 16, 16>}, {transform_indices = @transform_3, window_bounds = array<i64: 1, 4, 16, 16>}]} {
    %c0 = arith.constant 0 : index
    %c0_0 = arith.constant 0 : index
    %c0_1 = arith.constant 0 : index
    %c0_2 = arith.constant 0 : index
    %0 = vector.load %arg3[%c0, %c0_0, %c0_1, %c0_2] : memref<1x1x16x16xf32, #tpu.memory_space<vmem>>, vector<1x1x16x16xf32>
    %1 = vector.shape_cast %0 : vector<1x1x16x16xf32> to vector<16x16xf32>
    %c0_3 = arith.constant 0 : index
    %c0_4 = arith.constant 0 : index
    %2 = vector.load %arg1[%c0_3, %c0_4] : memref<64x16xf32, #tpu.memory_space<vmem>>, vector<64x16xf32>
    %cst = arith.constant dense<0.000000e+00> : vector<64x16xf32>
    %3 = tpu.matmul %2, %1, %cst {dimension_numbers = #tpu.dot_dimension_numbers<[1], [0], [0], [1], [0, 0, 1, 1], [], []>, precision = #tpu.contract_precision<fp32>} : vector<64x16xf32>, vector<16x16xf32>, vector<64x16xf32> -> vector<64x16xf32>
    %4 = vector.extract_strided_slice %3 {offsets = [0, 0], sizes = [16, 16], strides = [1, 1]} : vector<64x16xf32> to vector<16x16xf32>
    %c0_5 = arith.constant 0 : index
    %c0_6 = arith.constant 0 : index
    %c0_7 = arith.constant 0 : index
    %5 = vector.load %arg2[%c0_5, %c0_6, %c0_7] : memref<4x16x16xf32, #tpu.memory_space<vmem>>, vector<1x16x16xf32>
    %6 = vector.shape_cast %5 : vector<1x16x16xf32> to vector<16x16xf32>
    %cst_8 = arith.constant dense<0.000000e+00> : vector<16x16xf32>
    %7 = tpu.matmul %4, %6, %cst_8 {dimension_numbers = #tpu.dot_dimension_numbers<[1], [0], [0], [1], [0, 0, 1, 1], [], []>, precision = #tpu.contract_precision<fp32>} : vector<16x16xf32>, vector<16x16xf32>, vector<16x16xf32> -> vector<16x16xf32>
    %c0_9 = arith.constant 0 : index
    %c0_10 = arith.constant 0 : index
    %c0_11 = arith.constant 0 : index
    %c0_12 = arith.constant 0 : index
    %8 = vector.load %arg4[%c0_9, %c0_10, %c0_11, %c0_12] : memref<1x4x16x16xf32, #tpu.memory_space<vmem>>, vector<1x1x16x16xf32>
    %9 = vector.shape_cast %8 : vector<1x1x16x16xf32> to vector<16x16xf32>
    %10 = vector.shape_cast %7 : vector<16x16xf32> to vector<1x1x16x16xf32>
    tpu.vector_store %arg4[%c0_9, %c0_10, %c0_11, %c0_12], %10 {strides = array<i32>} : memref<1x4x16x16xf32, #tpu.memory_space<vmem>>, vector<1x1x16x16xf32>,
    %11 = vector.extract_strided_slice %3 {offsets = [16, 0], sizes = [16, 16], strides = [1, 1]} : vector<64x16xf32> to vector<16x16xf32>
    %c1 = arith.constant 1 : index
    %c0_13 = arith.constant 0 : index
    %c0_14 = arith.constant 0 : index
    %12 = vector.load %arg2[%c1, %c0_13, %c0_14] : memref<4x16x16xf32, #tpu.memory_space<vmem>>, vector<1x16x16xf32>
    %13 = vector.shape_cast %12 : vector<1x16x16xf32> to vector<16x16xf32>
    %cst_15 = arith.constant dense<0.000000e+00> : vector<16x16xf32>
    %14 = tpu.matmul %11, %13, %cst_15 {dimension_numbers = #tpu.dot_dimension_numbers<[1], [0], [0], [1], [0, 0, 1, 1], [], []>, precision = #tpu.contract_precision<fp32>} : vector<16x16xf32>, vector<16x16xf32>, vector<16x16xf32> -> vector<16x16xf32>
    %c0_16 = arith.constant 0 : index
    %c1_17 = arith.constant 1 : index
    %c0_18 = arith.constant 0 : index
    %c0_19 = arith.constant 0 : index
    %15 = vector.load %arg4[%c0_16, %c1_17, %c0_18, %c0_19] : memref<1x4x16x16xf32, #tpu.memory_space<vmem>>, vector<1x1x16x16xf32>
    %16 = vector.shape_cast %15 : vector<1x1x16x16xf32> to vector<16x16xf32>
    %17 = vector.shape_cast %14 : vector<16x16xf32> to vector<1x1x16x16xf32>
    tpu.vector_store %arg4[%c0_16, %c1_17, %c0_18, %c0_19], %17 {strides = array<i32>} : memref<1x4x16x16xf32, #tpu.memory_space<vmem>>, vector<1x1x16x16xf32>,
    %18 = vector.extract_strided_slice %3 {offsets = [32, 0], sizes = [16, 16], strides = [1, 1]} : vector<64x16xf32> to vector<16x16xf32>
    %c2 = arith.constant 2 : index
    %c0_20 = arith.constant 0 : index
    %c0_21 = arith.constant 0 : index
    %19 = vector.load %arg2[%c2, %c0_20, %c0_21] : memref<4x16x16xf32, #tpu.memory_space<vmem>>, vector<1x16x16xf32>
    %20 = vector.shape_cast %19 : vector<1x16x16xf32> to vector<16x16xf32>
    %cst_22 = arith.constant dense<0.000000e+00> : vector<16x16xf32>
    %21 = tpu.matmul %18, %20, %cst_22 {dimension_numbers = #tpu.dot_dimension_numbers<[1], [0], [0], [1], [0, 0, 1, 1], [], []>, precision = #tpu.contract_precision<fp32>} : vector<16x16xf32>, vector<16x16xf32>, vector<16x16xf32> -> vector<16x16xf32>
    %c0_23 = arith.constant 0 : index
    %c2_24 = arith.constant 2 : index
    %c0_25 = arith.constant 0 : index
    %c0_26 = arith.constant 0 : index
    %22 = vector.load %arg4[%c0_23, %c2_24, %c0_25, %c0_26] : memref<1x4x16x16xf32, #tpu.memory_space<vmem>>, vector<1x1x16x16xf32>
    %23 = vector.shape_cast %22 : vector<1x1x16x16xf32> to vector<16x16xf32>
    %24 = vector.shape_cast %21 : vector<16x16xf32> to vector<1x1x16x16xf32>
    tpu.vector_store %arg4[%c0_23, %c2_24, %c0_25, %c0_26], %24 {strides = array<i32>} : memref<1x4x16x16xf32, #tpu.memory_space<vmem>>, vector<1x1x16x16xf32>,
    %25 = vector.extract_strided_slice %3 {offsets = [48, 0], sizes = [16, 16], strides = [1, 1]} : vector<64x16xf32> to vector<16x16xf32>
    %c3 = arith.constant 3 : index
    %c0_27 = arith.constant 0 : index
    %c0_28 = arith.constant 0 : index
    %26 = vector.load %arg2[%c3, %c0_27, %c0_28] : memref<4x16x16xf32, #tpu.memory_space<vmem>>, vector<1x16x16xf32>
    %27 = vector.shape_cast %26 : vector<1x16x16xf32> to vector<16x16xf32>
    %cst_29 = arith.constant dense<0.000000e+00> : vector<16x16xf32>
    %28 = tpu.matmul %25, %27, %cst_29 {dimension_numbers = #tpu.dot_dimension_numbers<[1], [0], [0], [1], [0, 0, 1, 1], [], []>, precision = #tpu.contract_precision<fp32>} : vector<16x16xf32>, vector<16x16xf32>, vector<16x16xf32> -> vector<16x16xf32>
    %c0_30 = arith.constant 0 : index
    %c3_31 = arith.constant 3 : index
    %c0_32 = arith.constant 0 : index
    %c0_33 = arith.constant 0 : index
    %29 = vector.load %arg4[%c0_30, %c3_31, %c0_32, %c0_33] : memref<1x4x16x16xf32, #tpu.memory_space<vmem>>, vector<1x1x16x16xf32>
    %30 = vector.shape_cast %29 : vector<1x1x16x16xf32> to vector<16x16xf32>
    %31 = vector.shape_cast %28 : vector<16x16xf32> to vector<1x1x16x16xf32>
    tpu.vector_store %arg4[%c0_30, %c3_31, %c0_32, %c0_33], %31 {strides = array<i32>} : memref<1x4x16x16xf32, #tpu.memory_space<vmem>>, vector<1x1x16x16xf32>,
    return
  }
  func.func @transform_0(%arg0: i32) -> (i32, i32) {
    %c0_i32 = arith.constant 0 : i32
    %c0_i32_0 = arith.constant 0 : i32
    %c0_i32_1 = arith.constant 0 : i32
    return %c0_i32, %c0_i32_0 : i32, i32
  }
  func.func @transform_1(%arg0: i32) -> (i32, i32, i32) {
    %c0_i32 = arith.constant 0 : i32
    %c0_i32_0 = arith.constant 0 : i32
    %c0_i32_1 = arith.constant 0 : i32
    %c0_i32_2 = arith.constant 0 : i32
    return %c0_i32, %c0_i32_0, %c0_i32_1 : i32, i32, i32
  }
  func.func @transform_2(%arg0: i32) -> (i32, i32, i32, i32) {
    %c0_i32 = arith.constant 0 : i32
    %c0_i32_0 = arith.constant 0 : i32
    %c0_i32_1 = arith.constant 0 : i32
    %c0_i32_2 = arith.constant 0 : i32
    return %arg0, %c0_i32, %c0_i32_0, %c0_i32_1 : i32, i32, i32, i32
  }
  func.func @transform_3(%arg0: i32) -> (i32, i32, i32, i32) {
    %c0_i32 = arith.constant 0 : i32
    %c0_i32_0 = arith.constant 0 : i32
    %c0_i32_1 = arith.constant 0 : i32
    %c0_i32_2 = arith.constant 0 : i32
    return %arg0, %c0_i32, %c0_i32_0, %c0_i32_1 : i32, i32, i32, i32
  }
}

</mosaic_0001>

<bundles_post_ra>
// kernel: tpu_custom_call.1
= control target key start
LH: loop header
LB: loop body
LE: loop exit
PB: predicated region body
PF: predicated region fallthrough
CT: control target
= control target key end

     0   :  { %8 = vsyncpa [#allocation3], 0  ;;  %s4344_s0 = inlined_call_operand.vmem [shape: f32[64,16], index: 0, kind: input, shape index: {}]   ;;  %s4345_s1 = inlined_call_operand.vmem [shape: f32[4,16,16], index: 1, kind: input, shape index: {}]   ;;  %s4346_s2 = inlined_call_operand.hbm [shape: f32[2,1,16,16], index: 2, kind: input, shape index: {}]   ;;  %s4347_s3 = inlined_call_operand.hbm [shape: f32[2,4,16,16], index: 3, kind: output, shape index: {}]  }
   0x1   :  { %10 = vsyncpa [#allocation3 + $0x1], 0 }
   0x2   :  { %11 = vsyncpa [#allocation4], 0 }
   0x3   :  { %13 = vsyncpa [#allocation4 + $0x1], 0  ;;  %s3947_s12 = smov 0   ;;  %s3949_s13 = smov 0  }
   0x4   :  { %s3951_s14 = smov 0   ;;  %s3953_s15 = smov 0  }
   0x5 LB: > { %s3968_s16 = sadd.s32 4294967295, %s3919_s15   ;;  %s3125_s17 = sadd.s32 4294967294, %s3919_s15   ;;  %s3919_s15 = sphi %s3953_s15, %s4360_s15   ;;  %s3915_s14 = sphi %s3951_s14, %s4359_s14   ;;  %s3911_s13 = sphi %s3949_s13, %s4358_s13   ;;  %s3907_s12 = sphi %s3947_s12, %s4357_s12  }
   0x6   : > { %s3972_s18 = sadd.s32 1, %s3919_s15   ;;  %s68_s19 = sadd.s32 1, %s3915_s14 }
   0x7   : > { %s65_s20 = ssub.s32 %s3919_s15, %s3972_s18  ;;  %p75_p0 = scmp.ne.s32.totalorder %s3915_s14, %s3911_s13 }
   0x8   : > { %p66_p1 = scmp.eq.s32.totalorder %s65_s20, 0  ;;  %p76_p2 = scmp.eq.s32.totalorder %s3919_s15, 0 }
   0x9   : > { %p81_p3 = scmp.ne.s32.totalorder %s3911_s13, %s3907_s12  ;;  %p82_p4 = scmp.eq.s32.totalorder %s3968_s16, 0 }
   0xa   : > { %s3984_s21 = scalar_select %p66_p1, %s3915_s14, %s68_s19  }
   0xb   : > { %p3986_p5 = por %p76_p2, %p75_p0  ;;  %p3990_p6 = por %p82_p4, %p81_p3 }
   0xc   : > { %p105_p7 = scmp.eq.s32.totalorder %s3968_s16, 1  ;;  %p111_p8 = scmp.eq.s32.totalorder %s3125_s17, 1 }
   0xd   : > { %p3785_p10 = scmp.lt.s32.totalorder %s3919_s15, 2  ;;  %s137_s26 = sand.u32 1, %s3915_s14  }
   0xe   : > { %p3997_p11 = por %p105_p7, %p75_p0  ;;  %p4001_p12 = por %p111_p8, %p81_p3 }
   0xf   : > { %s3151_s27 = sshll.u32 %s3919_s15, 8  ;;  %s3128_s28 = sshll.u32 %s137_s26, 4 }
  0x10   : > { %s4351_s24 = scalar_select %p3997_p11, 1, 0 }
  0x11   : > { %s4352_s25 = scalar_select %p4001_p12, 1, 0 }
  0x12   : > { %s4010_s4 = scalar_lea.hbm %s4346_s2, %s3151_s27  ;;  %s141_s5 = scalar_lea.vmem [#allocation2], %s3128_s28 }
  0x13   : > { %s148_s6 = sshll.u32 %s141_s5, 4  ;;  %p4014_p13 = pnand %p3785_p10, %p3986_p5  ;;  %s4018_s6 = int_to_ptr.vmem [resolvable:$true] %s148_s6 }
  0x14   : > { %s4020_s8 = scalar_lea.sflag [#allocation3], %s137_s26  ;;  %s3823_s9 = scalar_lea.hbm %s4010_s4, 256 }
  0x15   : > { %p3824_p0 = scmp.ne.s32.totalorder %s4010_s4, %s3823_s9  ;;  %p3825_p1 = pneg %p4014_p13 }
  0x16   : > { %s3828_s17 = scalar_lea.hbm %s4346_s2, 512  ;;  %p3829_p4 = scmp.lt.u32.totalorder %s4010_s4, %s4346_s2 }
  0x17   : > { %p3826_p2 = pnand %p3825_p1, %p3824_p0  ;;  %p3830_p5 = scmp.lt.u32.totalorder %s3828_s17, %s3823_s9 }
  0x18   : > { %p3832_p8 = scmp.lt.u32.totalorder %s3823_s9, %s4010_s4 }
  0x19   : > { %p3827_p3 = pneg %p3826_p2  ;;  %p3831_p7 = por %p3830_p5, %p3829_p4 }
  0x1b   : > { %p3833_p10 = por %p3832_p8, %p3831_p7 }
  0x1d   : > { %p3834_p9 = pnand %p3833_p10, %p3827_p3 }
  0x1f   : > { %3837 = shalt.err (!%p3834_p9)
}
  0x20   : > { %s3838_s22 = scalar_lea.vmem %s4018_s6, 256  ;;  %s3921_s26 = smov [#allocation2]  }
  0x21   : > { %p3839_p0 = scmp.ne.s32.totalorder %s4018_s6, %s3838_s22  ;;  %s3843_s27 = sshll.u32 %s3921_s26, 4  ;;  %s3844_s27 = int_to_ptr.vmem [resolvable:$false] %s3843_s27 }
  0x22   : > { %s3845_s28 = scalar_lea.vmem %s3844_s27, 512  ;;  %p3846_p11 = scmp.lt.s32.totalorder %s4018_s6, %s3844_s27 }
  0x23   : > { %p3841_p2 = pnand %p3839_p0, %p3825_p1  ;;  %p3847_p4 = scmp.lt.s32.totalorder %s3845_s28, %s3838_s22 }
  0x25   : > { %p3842_p12 = pneg %p3841_p2  ;;  %p3848_p5 = por %p3847_p4, %p3846_p11 }
  0x27   : > { %p3849_p7 = pnand %p3848_p5, %p3842_p12 }
  0x29   : > { %3852 = shalt.err (!%p3849_p7)
}
  0x2a   : > { %s3922_s29 = smov 128   ;;  %s3923_s30 = smov 8  }
  0x2b   : > { %3780 = dma.hbm_to_vmem [thread:$0]  (!%p4014_p13), %s4010_s4, 256, %s4018_s6, %s4020_s8, %s3922_s29, %s3922_s29, %s3923_s30  }
  0x2c   : > { %p3131_p9 = scmp.ge.s32.totalorder %s3919_s15, 1  ;;  %p156_p1 = scmp.lt.s32.totalorder %s3919_s15, 3 }
  0x2e   : > { %p157_p3 = pnand %p3131_p9, %p156_p1 }
  0x2f   : > { %s4051_s5 = sand.u32 (!%p157_p3), 1, %s3911_s13  }
  0x30   : > { %160 = sbr.rel (%p157_p3) target bundleno = 775 (0x307), region = 32  ;;  %s3132_s9 = sshll.u32 (!%p157_p3), %s4051_s5, 4 }
  0x31   : > { %s163_s10 = scalar_lea.sflag (!%p157_p3), [#allocation3], %s4051_s5  ;;  %s166_s11 = scalar_lea.vmem (!%p157_p3), [#allocation2], %s3132_s9 }
  0x37   : > { %3898 = dma.done.wait (%p3990_p6), %s163_s10, 256  }
  0x38   : > { %3900 = vsyncadd (%p3990_p6), %s163_s10, 4294967040  ;;  %vm199_vm0 = vcmask 130048   ;;  %v189_v0 = vld [vmem:[%s166_s11] sm:$0xff]  ;;  %v190_v1 = vld [vmem:[%s166_s11 + $0x8] sm:$0xff]  ;;  %s3133_s10 = sshll.u32 %s4051_s5, 6  ;;  %s3152_s6 = sshll.u32 %s3968_s16, 10 }
  0x39   : > { %v191_v2 = vld [vmem:[%s4344_s0] sm:$0xff]  ;;  %v225_v3 = vand.u32 4294901760, %v189_v0  ;;  %v228_v4 = vand.u32 4294901760, %v190_v1  ;;  %v192_v6 = vld [vmem:[%s4344_s0 + $0x8] sm:$0xff]  ;;  %v193_v7 = vld [vmem:[%s4344_s0 + $0x10] sm:$0xff]  ;;  %s188_s11 = scalar_lea.vmem [#allocation5], %s3133_s10  ;;  %s4298_s17 = scalar_lea.hbm %s4347_s3, %s3152_s6 }
  0x3a   : > { %v201_v5 = vsel %vm199_vm0, %v191_v2, 0  ;;  %v194_v8 = vld [vmem:[%s4344_s0 + $0x18] sm:$0xff]  ;;  %v204_v10 = vsel %vm199_vm0, %v192_v6, 0  ;;  %v207_v11 = vsel %vm199_vm0, %v193_v7, 0  ;;  %v195_v13 = vld [vmem:[%s4344_s0 + $0x20] sm:$0xff]  ;;  %v196_v18 = vld [vmem:[%s4344_s0 + $0x28] sm:$0xff] }
  0x3b   : > { %v4072_v9 = vand.u32 4294901760, %v201_v5  ;;  %v210_v12 = vsel %vm199_vm0, %v194_v8, 0  ;;  %v4080_v14 = vpack.c.bf16 %v228_v4, %v225_v3  ;;  %v4082_v15 = vand.u32 4294901760, %v204_v10  ;;  %v197_v39 = vld [vmem:[%s4344_s0 + $0x30] sm:$0xff]  ;;  %v198_v48 = vld [vmem:[%s4344_s0 + $0x38] sm:$0xff]  ;;  %v984_v8 = vld [vmem:[%s4345_s1] sm:$0xff] }
  0x3c   : > { %v4084_v16 = vsub.f32 %v189_v0, %v225_v3  ;;  %v4086_v17 = vsub.f32 %v190_v1, %v228_v4  ;;  %v4094_v20 = vand.u32 4294901760, %v207_v11  ;;  %v4096_v21 = vand.u32 4294901760, %v210_v12  ;;  %s3052_s4 = sshll.u32 %s188_s11, 4  ;;  %s3039_s19 = scalar_lea.sflag [#allocation4], %s4051_s5  ;;  %s4293_s4 = int_to_ptr.vmem [resolvable:$true] %s3052_s4 }
  0x3d   : > { %v4092_v19 = vsub.f32 %v201_v5, %v4072_v9  ;;  %v213_v22 = vsel %vm199_vm0, %v195_v13, 0  ;;  %3574 = vmatprep.subr.bf16.mxu0 %v4080_v14  ;;  %v4101_v23 = vsub.f32 %v204_v10, %v4082_v15  ;;  %v216_v30 = vsel %vm199_vm0, %v196_v18, 0  ;;  %s3853_s23 = scalar_lea.vmem %s4293_s4, 1024  ;;  %p4354_p11 = scmp.ne.s32.totalorder %s4351_s24, 0 }
  0x3e   : > { %v374_v24 = vand.u32 4294901760, %v4084_v16  ;;  %v381_v25 = vand.u32 4294901760, %v4086_v17  ;;  %v4105_v26 = vand.u32 4294901760, %v213_v22  ;;  %3576 = vmatpush3.bf16.msra.mxu0 %v4080_v14  ;;  %v4110_v28 = vsub.f32 %v207_v11, %v4094_v20  ;;  %p3854_p6 = scmp.ne.s32.totalorder %s4293_s4, %s3853_s23  ;;  %s3924_s16 = smov [#allocation5]  }
  0x3f   : > { %v293_v27 = vand.u32 4294901760, %v4092_v19  ;;  %v4113_v29 = vsub.f32 %v210_v12, %v4096_v21  ;;  %v303_v31 = vand.u32 4294901760, %v4101_v23  ;;  %v4131_v38 = vand.u32 4294901760, %v216_v30  ;;  %s3857_s20 = sshll.u32 %s3924_s16, 4  ;;  %s3858_s20 = int_to_ptr.vmem [resolvable:$false] %s3857_s20 }
  0x40   : > { %v375_v32 = vsub.f32 %v4084_v16, %v374_v24  ;;  %v382_v33 = vsub.f32 %v4086_v17, %v381_v25  ;;  %v4124_v34 = vsub.f32 %v213_v22, %v4105_v26  ;;  %v313_v36 = vand.u32 4294901760, %v4110_v28  ;;  %p3855_p12 = pnand %p3854_p6, %p4354_p11  ;;  %s3859_s22 = scalar_lea.vmem %s3858_s20, 2048 }
  0x41   : > { %v294_v35 = vsub.f32 %v4092_v19, %v293_v27  ;;  %v323_v37 = vand.u32 4294901760, %v4113_v29  ;;  %v304_v40 = vsub.f32 %v4101_v23, %v303_v31  ;;  %v4147_v47 = vsub.f32 %v216_v30, %v4131_v38  ;;  %p3860_p8 = scmp.lt.s32.totalorder %s4293_s4, %s3858_s20  ;;  %p3861_p10 = scmp.lt.s32.totalorder %s3859_s22, %s3853_s23 }
  0x42   : > { %v376_v41 = vand.u32 4294901760, %v375_v32  ;;  %v383_v42 = vand.u32 4294901760, %v382_v33  ;;  %v333_v43 = vand.u32 4294901760, %v4124_v34  ;;  %v314_v45 = vsub.f32 %v4110_v28, %v313_v36  ;;  %p3856_p13 = pneg %p3855_p12 }
  0x43   : > { %v295_v44 = vand.u32 4294901760, %v294_v35  ;;  %v324_v46 = vsub.f32 %v4113_v29, %v323_v37  ;;  %v305_v49 = vand.u32 4294901760, %v304_v40  ;;  %v219_v52 = vsel %vm199_vm0, %v197_v39, 0  ;;  %p3862_p0 = por %p3861_p10, %p3860_p8 }
  0x44   : > { %v3577_v50 = vpack.c.bf16 %v383_v42, %v376_v41  ;;  %v334_v51 = vsub.f32 %v4124_v34, %v333_v43  ;;  %v315_v53 = vand.u32 4294901760, %v314_v45  ;;  %v343_v54 = vand.u32 4294901760, %v4147_v47  ;;  %v3135_v45 = vld [vmem:[%s4345_s1 + $0x18] sm:$0xff] }
  0x45   : > { %3313 = vmatprep.mubr.f32.mxu0 %v295_v44  ;;  %v4157_v55 = vand.u32 4294901760, %v219_v52  ;;  %v325_v56 = vand.u32 4294901760, %v324_v46  ;;  %v222_v57 = vsel %vm199_vm0, %v198_v48, 0  ;;  %v3581_v58 = vpack.c.bf16 %v4086_v17, %v4084_v16  ;;  %v3134_v44 = vld [vmem:[%s4345_s1 + $0x10] sm:$0xff]  ;;  %p3863_p2 = pnand %p3862_p0, %p3856_p13 }
  0x46   : > { %3314 = vmatmul.mubr.f32.vlgmr.msra.gmra.mrb[0].mxu0 %v305_v49  ;;  %3578 = vmatprep.subr.bf16.mxu0 %v3577_v50  ;;  %v335_v59 = vand.u32 4294901760, %v334_v51  ;;  %v344_v60 = vsub.f32 %v4147_v47, %v343_v54  ;;  %v361_v62 = vand.u32 4294901760, %v222_v57  ;;  %v3589_v7 = vpack.c.bf16 %v381_v25, %v374_v24 }
  0x47   : > { %3580 = vmatpush3.bf16.msra.mxu0 %v3577_v50  ;;  %3316 = vmatprep.mubr.f32.mxu0 %v315_v53  ;;  %v352_v61 = vsub.f32 %v219_v52, %v4157_v55  ;;  %v993_v10 = vand.u32 4294901760, %v984_v8  ;;  %v1506_v46 = vand.u32 4294901760, %v3134_v44 }
  0x48   : > { %3582 = vmatprep.subr.bf16.mxu0 %v3581_v58  ;;  %v362_v0 = vsub.f32 %v222_v57, %v361_v62  ;;  %v345_v1 = vand.u32 4294901760, %v344_v60 }
  0x49   : > { %v353_v63 = vand.u32 4294901760, %v352_v61  ;;  %v1081_v13 = vsub.f32 %v984_v8, %v993_v10  ;;  %v1594_v49 = vsub.f32 %v3134_v44, %v1506_v46  ;;  %v3138_v8 = vld [vmem:[%s4345_s1 + $0x20] sm:$0xff] }
  0x4a   : > { %3317 = vmatmul.mubr.f32.gmra.mrb[2].mxu0 %v325_v56  ;;  %v363_v3 = vand.u32 4294901760, %v362_v0 }
  0x4b   : > { %3319 = vmatprep.mubr.f32.mxu0 %v335_v59  ;;  %v354_v2 = vsub.f32 %v352_v61, %v353_v63 }
  0x4c   : > { %v364_v5 = vsub.f32 %v362_v0, %v363_v3 }
  0x4d   : > { %v355_v4 = vand.u32 4294901760, %v354_v2 }
  0x4e   : > { %3320 = vmatmul.mubr.f32.gmra.mrb[4].mxu0 %v345_v1  ;;  %v365_v6 = vand.u32 4294901760, %v364_v5 }
  0x4f   : > { %3322 = vmatprep.mubr.f32.mxu0 %v355_v4 }
  0x52   : > { %3323 = vmatmul.mubr.f32.gmra.mrb[6].mxu0 %v365_v6 }
  0x53   : > { %3329 = vmatprep.mubr.f32.mxu0 %v4072_v9 }
  0x56   : > { %3330 = vmatmul.mubr.f32.vlgmr.msra.gmra.mrb[0].mxu0 %v4082_v15 }
  0x57   : > { %3584 = vmatpush3.bf16.msra.mxu0 %v3581_v58  ;;  %3332 = vmatprep.mubr.f32.mxu0 %v4094_v20 }
  0x58   : > { %3586 = vmatprep.subr.bf16.mxu0 %v4080_v14 }
  0x5a   : > { %3333 = vmatmul.mubr.f32.gmra.mrb[2].mxu0 %v4096_v21 }
  0x5b   : > { %3335 = vmatprep.mubr.f32.mxu0 %v4105_v26 }
  0x5e   : > { %3336 = vmatmul.mubr.f32.gmra.mrb[4].mxu0 %v4131_v38 }
  0x5f   : > { %3338 = vmatprep.mubr.f32.mxu0 %v4157_v55 }
  0x62   : > { %3339 = vmatmul.mubr.f32.gmra.mrb[6].mxu0 %v361_v62 }
  0x63   : > { %3345 = vmatprep.mubr.f32.mxu0 %v4092_v19 }
  0x66   : > { %3346 = vmatmul.mubr.f32.vlgmr.msra.gmra.mrb[0].mxu0 %v4101_v23 }
  0x67   : > { %3588 = vmatpush3.bf16.msra.mxu0 %v4080_v14  ;;  %3348 = vmatprep.mubr.f32.mxu0 %v4110_v28 }
  0x68   : > { %3590 = vmatprep.subr.bf16.mxu0 %v3589_v7 }
  0x6a   : > { %3349 = vmatmul.mubr.f32.gmra.mrb[2].mxu0 %v4113_v29 }
  0x6b   : > { %3351 = vmatprep.mubr.f32.mxu0 %v4124_v34 }
  0x6e   : > { %3352 = vmatmul.mubr.f32.gmra.mrb[4].mxu0 %v4147_v47  ;;  %v1509_v47 = vand.u32 4294901760, %v3135_v45 }
  0x6f   : > { %3354 = vmatprep.mubr.f32.mxu0 %v352_v61 }
  0x70   : > { %v1601_v50 = vsub.f32 %v3135_v45, %v1509_v47  ;;  %v3621_v58 = vpack.c.bf16 %v1509_v47, %v1506_v46 }
  0x72   : > { %3355 = vmatmul.mubr.f32.gmra.mrb[6].mxu0 %v362_v0  ;;  %v3629_v6 = vpack.c.bf16 %v1601_v50, %v1594_v49 }
  0x73   : > { %3361 = vmatprep.mubr.f32.mxu0 %v293_v27 }
  0x76   : > { %3362 = vmatmul.mubr.f32.vlgmr.msra.gmra.mrb[0].mxu0 %v303_v31 }
  0x77   : > { %3592 = vmatpush3.bf16.msra.mxu0 %v3589_v7  ;;  %3364 = vmatprep.mubr.f32.mxu0 %v313_v36 }
  0x78   : > { %3594 = vmatprep.subr.bf16.mxu0 %v4080_v14 }
  0x7a   : > { %3365 = vmatmul.mubr.f32.gmra.mrb[2].mxu0 %v323_v37 }
  0x7b   : > { %3367 = vmatprep.mubr.f32.mxu0 %v333_v43 }
  0x7e   : > { %3368 = vmatmul.mubr.f32.gmra.mrb[4].mxu0 %v343_v54  ;;  %v1595_v54 = vand.u32 4294901760, %v1594_v49 }
  0x7f   : > { %3370 = vmatprep.mubr.f32.mxu0 %v353_v63 }
  0x80   : > { %v1596_v59 = vsub.f32 %v1594_v49, %v1595_v54 }
  0x82   : > { %3371 = vmatmul.mubr.f32.gmra.mrb[6].mxu0 %v363_v3  ;;  %v1597_v63 = vand.u32 4294901760, %v1596_v59 }
  0x83   : > { %3377 = vmatprep.mubr.f32.mxu0 %v4072_v9 }
  0x86   : > { %3378 = vmatmul.mubr.f32.vlgmr.msra.gmra.mrb[0].mxu0 %v4082_v15 }
  0x87   : > { %3596 = vmatpush3.bf16.msra.mxu0 %v4080_v14  ;;  %3380 = vmatprep.mubr.f32.mxu0 %v4094_v20 }
  0x8a   : > { %3381 = vmatmul.mubr.f32.gmra.mrb[2].mxu0 %v4096_v21 }
  0x8b   : > { %3383 = vmatprep.mubr.f32.mxu0 %v4105_v26 }
  0x8e   : > { %3384 = vmatmul.mubr.f32.gmra.mrb[4].mxu0 %v4131_v38 }
  0x8f   : > { %3386 = vmatprep.mubr.f32.mxu0 %v4157_v55 }
  0x92   : > { %3387 = vmatmul.mubr.f32.gmra.mrb[6].mxu0 %v361_v62 }
  0x93   : > { %3393 = vmatprep.mubr.f32.mxu0 %v4072_v9  ;;  %v985_v9 = vld [vmem:[%s4345_s1 + $0x8] sm:$0xff] }
  0x94   : > { %v996_v11 = vand.u32 4294901760, %v985_v9 }
  0x96   : > { %3394 = vmatmul.mubr.f32.vlgmr.msra.gmra.mrb[0].mxu0 %v4082_v15  ;;  %v4215_v12 = vpack.c.bf16 %v996_v11, %v993_v10  ;;  %v1088_v14 = vsub.f32 %v985_v9, %v996_v11  ;;  %v1082_v15 = vand.u32 4294901760, %v1081_v13  ;;  %v3139_v9 = vld [vmem:[%s4345_s1 + $0x28] sm:$0xff]  ;;  %v2020_v10 = vand.u32 4294901760, %v3138_v8 }
  0x97   : > { %3396 = vmatprep.mubr.f32.mxu0 %v4094_v20  ;;  %v2023_v11 = vand.u32 4294901760, %v3139_v9 }
  0x98   : > { %3598 = vmatprep.subr.bf16.mxu1 %v4215_v12  ;;  %v1089_v16 = vand.u32 4294901760, %v1088_v14  ;;  %v1083_v17 = vsub.f32 %v1081_v13, %v1082_v15  ;;  %v3605_v22 = vpack.c.bf16 %v1088_v14, %v1081_v13  ;;  %v2108_v13 = vsub.f32 %v3138_v8, %v2020_v10 }
  0x99   : > { %3600 = vmatpush3.bf16.msra.mxu1 %v4215_v12 }
  0x9a   : > { %3397 = vmatmul.mubr.f32.gmra.mrb[2].mxu0 %v4096_v21  ;;  %v1090_v18 = vsub.f32 %v1088_v14, %v1089_v16  ;;  %v1084_v19 = vand.u32 4294901760, %v1083_v17  ;;  %v3613_v23 = vpack.c.bf16 %v1089_v16, %v1082_v15  ;;  %v2115_v14 = vsub.f32 %v3139_v9, %v2023_v11 }
  0x9b   : > { %3399 = vmatprep.mubr.f32.mxu0 %v4105_v26 }
  0x9c   : > { %v1091_v20 = vand.u32 4294901760, %v1090_v18  ;;  %v2109_v18 = vand.u32 4294901760, %v2108_v13 }
  0x9e   : > { %3400 = vmatmul.mubr.f32.gmra.mrb[4].mxu0 %v4131_v38  ;;  %v3601_v21 = vpack.c.bf16 %v1091_v20, %v1084_v19  ;;  %v2116_v19 = vand.u32 4294901760, %v2115_v14 }
  0x9f   : > { %3402 = vmatprep.mubr.f32.mxu0 %v4157_v55  ;;  %v1602_v55 = vand.u32 4294901760, %v1601_v50 }
  0xa0   : > { %3602 = vmatprep.subr.bf16.mxu1 %v3601_v21 }
  0xa1   : > { %v1603_v60 = vsub.f32 %v1601_v50, %v1602_v55  ;;  %v3637_v7 = vpack.c.bf16 %v1602_v55, %v1595_v54 }
  0xa2   : > { %3403 = vmatmul.mubr.f32.gmra.mrb[6].mxu0 %v361_v62 }
  0xa3   : > { %v1604_v0 = vand.u32 4294901760, %v1603_v60 }
  0xa5   : > { %v3625_v3 = vpack.c.bf16 %v1604_v0, %v1597_v63 }
 0x169   : > { %v3395_v24 = vpop.f32.mrb[0].mxu0 }
 0x16a   : > { %v990_v25 = vsel %vm199_vm0, %v3395_v24, 0  ;;  %v938_v26 = vpop.f32.mrb[1].mxu0  ;;  %v2117_v24 = vsub.f32 %v2115_v14, %v2116_v19 }
 0x16b   : > { %v1069_v27 = vand.u32 4294901760, %v990_v25  ;;  %v987_v28 = vsel %vm199_vm0, %v938_v26, 0 }
 0x16c   : > { %v1059_v29 = vand.u32 4294901760, %v987_v28 }
 0x16d   : > { %v1070_v30 = vsub.f32 %v990_v25, %v1069_v27  ;;  %v3398_v31 = vpop.f32.mrb[2].mxu0 }
 0x16e   : > { %v1060_v32 = vsub.f32 %v987_v28, %v1059_v29  ;;  %v950_v33 = vpop.f32.mrb[3].mxu0  ;;  %v1503_v51 = vsel %vm199_vm0, %v3398_v31, 0  ;;  %v2118_v28 = vand.u32 4294901760, %v2117_v24 }
 0x16f   : > { %v1071_v34 = vand.u32 4294901760, %v1070_v30  ;;  %v1500_v48 = vsel %vm199_vm0, %v950_v33, 0  ;;  %v4241_v53 = vand.u32 4294901760, %v1503_v51 }
 0x170   : > { %v1061_v35 = vand.u32 4294901760, %v1060_v32  ;;  %v4239_v52 = vand.u32 4294901760, %v1500_v48 }
 0x171   : > { %v4221_v36 = vpop.f32.mrb[4].mxu0  ;;  %v1072_v37 = vsub.f32 %v1070_v30, %v1071_v34  ;;  %v1583_v57 = vsub.f32 %v1503_v51, %v4241_v53 }
 0x172   : > { %v4223_v38 = vpop.f32.mrb[5].mxu0  ;;  %v1062_v39 = vsub.f32 %v1060_v32, %v1061_v35  ;;  %v1573_v56 = vsub.f32 %v1500_v48, %v4239_v52  ;;  %v2017_v15 = vsel %vm199_vm0, %v4221_v36, 0  ;;  %v3142_v36 = vld [vmem:[%s4345_s1 + $0x30] sm:$0xff] }
 0x173   : > { %v1073_v42 = vand.u32 4294901760, %v1072_v37  ;;  %v1584_v62 = vand.u32 4294901760, %v1583_v57  ;;  %v4262_v17 = vand.u32 4294901760, %v2017_v15  ;;  %v3143_v37 = vld [vmem:[%s4345_s1 + $0x38] sm:$0xff] }
 0x174   : > { %v1063_v40 = vand.u32 4294901760, %v1062_v39  ;;  %v1574_v61 = vand.u32 4294901760, %v1573_v56  ;;  %v2537_v39 = vand.u32 4294901760, %v3143_v37 }
 0x175   : > { %v4225_v41 = vpop.f32.mrb[6].mxu0  ;;  %v1585_v2 = vsub.f32 %v1583_v57, %v1584_v62 }
 0x176   : > { %v4227_v43 = vpop.f32.mrb[7].mxu0  ;;  %3409 = vmatprep.mubr.f32.mxu1 %v1063_v40  ;;  %v1575_v1 = vsub.f32 %v1573_v56, %v1574_v61  ;;  %v2629_v44 = vsub.f32 %v3143_v37, %v2537_v39  ;;  %v2531_v45 = vsel %vm199_vm0, %v4225_v41, 0 }
 0x177   : > { %3410 = vmatmul.mubr.f32.vlgmr.msra.gmra.mrb[0].mxu1 %v1073_v42  ;;  %v1586_v5 = vand.u32 4294901760, %v1585_v2  ;;  %v2528_v40 = vsel %vm199_vm0, %v4227_v43, 0  ;;  %v2610_v47 = vand.u32 4294901760, %v2531_v45 }
 0x178   : > { %3604 = vmatpush3.bf16.msra.mxu1 %v3601_v21  ;;  %3416 = vmatprep.mubr.f32.mxu1 %v1059_v29  ;;  %v1576_v4 = vand.u32 4294901760, %v1575_v1  ;;  %v2097_v21 = vsub.f32 %v2017_v15, %v4262_v17  ;;  %v2600_v46 = vand.u32 4294901760, %v2528_v40  ;;  %v2630_v49 = vand.u32 4294901760, %v2629_v44 }
 0x179   : > { %3606 = vmatprep.subr.bf16.mxu1 %v3605_v22  ;;  %v2611_v51 = vsub.f32 %v2531_v45, %v2610_v47 }
 0x17a   : > { %v2098_v26 = vand.u32 4294901760, %v2097_v21  ;;  %v2601_v50 = vsub.f32 %v2528_v40, %v2600_v46  ;;  %v2631_v54 = vsub.f32 %v2629_v44, %v2630_v49 }
 0x17b   : > { %v2612_v41 = vand.u32 4294901760, %v2611_v51 }
 0x17c   : > { %v2602_v43 = vand.u32 4294901760, %v2601_v50 }
 0x17f   : > { %3417 = vmatmul.mubr.f32.vlgmr.msra.gmra.mrb[0].mxu1 %v1069_v27 }
 0x180   : > { %3608 = vmatpush3.bf16.msra.mxu1 %v3605_v22  ;;  %3423 = vmatprep.mubr.f32.mxu1 %v1060_v32  ;;  %v3645_v22 = vpack.c.bf16 %v2023_v11, %v2020_v10 }
 0x181   : > { %3610 = vmatprep.subr.bf16.mxu1 %v4215_v12 }
 0x187   : > { %3424 = vmatmul.mubr.f32.vlgmr.msra.gmra.mrb[0].mxu1 %v1070_v30  ;;  %v2099_v30 = vsub.f32 %v2097_v21, %v2098_v26 }
 0x188   : > { %3612 = vmatpush3.bf16.msra.mxu1 %v4215_v12  ;;  %3430 = vmatprep.mubr.f32.mxu1 %v1061_v35  ;;  %v3661_v35 = vpack.c.bf16 %v2116_v19, %v2109_v18 }
 0x189   : > { %3614 = vmatprep.subr.bf16.mxu1 %v3613_v23  ;;  %v2100_v33 = vand.u32 4294901760, %v2099_v30 }
 0x18f   : > { %3431 = vmatmul.mubr.f32.vlgmr.msra.gmra.mrb[0].mxu1 %v1071_v34  ;;  %v3653_v34 = vpack.c.bf16 %v2115_v14, %v2108_v13 }
 0x190   : > { %3616 = vmatpush3.bf16.msra.mxu1 %v3613_v23  ;;  %3437 = vmatprep.mubr.f32.mxu1 %v1059_v29  ;;  %v2110_v23 = vsub.f32 %v2108_v13, %v2109_v18 }
 0x191   : > { %3618 = vmatprep.subr.bf16.mxu1 %v4215_v12 }
 0x197   : > { %3438 = vmatmul.mubr.f32.vlgmr.msra.gmra.mrb[0].mxu1 %v1069_v27 }
 0x198   : > { %3620 = vmatpush3.bf16.msra.mxu1 %v4215_v12  ;;  %3444 = vmatprep.mubr.f32.mxu1 %v1059_v29  ;;  %v2014_v12 = vsel %vm199_vm0, %v4223_v38, 0  ;;  %v2534_v38 = vand.u32 4294901760, %v3142_v36 }
 0x199   : > { %3622 = vmatprep.subr.bf16.mxu1 %v3621_v58  ;;  %v4259_v16 = vand.u32 4294901760, %v2014_v12 }
 0x19a   : > { %v2622_v42 = vsub.f32 %v3142_v36, %v2534_v38 }
 0x19b   : > { %v2087_v20 = vsub.f32 %v2014_v12, %v4259_v16 }
 0x19c   : > { %v2623_v48 = vand.u32 4294901760, %v2622_v42 }
 0x19d   : > { %v2088_v25 = vand.u32 4294901760, %v2087_v20 }
 0x19e   : > { %v3685_v63 = vpack.c.bf16 %v2630_v49, %v2623_v48 }
 0x19f   : > { %3445 = vmatmul.mubr.f32.vlgmr.msra.gmra.mrb[0].mxu1 %v1069_v27  ;;  %v2111_v27 = vand.u32 4294901760, %v2110_v23  ;;  %v2089_v29 = vsub.f32 %v2087_v20, %v2088_v25 }
 0x1a0   : > { %3624 = vmatpush3.bf16.msra.mxu1 %v3621_v58  ;;  %3451 = vmatprep.mubr.f32.mxu1 %v1576_v4 }
 0x1a1   : > { %3626 = vmatprep.subr.bf16.mxu1 %v3625_v3  ;;  %v3649_v31 = vpack.c.bf16 %v2118_v28, %v2111_v27  ;;  %v2090_v32 = vand.u32 4294901760, %v2089_v29 }
 0x1a3   : > { %3452 = vmatmul.mubr.f32.vlgmr.msra.gmra.mrb[2].mxu1 %v1586_v5 }
 0x1a4   : > { %3628 = vmatpush3.bf16.msra.mxu1 %v3625_v3  ;;  %3458 = vmatprep.mubr.f32.mxu1 %v4239_v52 }
 0x1a5   : > { %3630 = vmatprep.subr.bf16.mxu1 %v3629_v6 }
 0x1ab   : > { %3459 = vmatmul.mubr.f32.vlgmr.msra.gmra.mrb[2].mxu1 %v4241_v53 }
 0x1ac   : > { %3632 = vmatpush3.bf16.msra.mxu1 %v3629_v6  ;;  %3465 = vmatprep.mubr.f32.mxu1 %v1573_v56  ;;  %v2632_v56 = vand.u32 4294901760, %v2631_v54 }
 0x1ad   : > { %3634 = vmatprep.subr.bf16.mxu1 %v3621_v58 }
 0x1b3   : > { %3466 = vmatmul.mubr.f32.vlgmr.msra.gmra.mrb[2].mxu1 %v1583_v57  ;;  %v2603_v57 = vsub.f32 %v2601_v50, %v2602_v43 }
 0x1b4   : > { %3636 = vmatpush3.bf16.msra.mxu1 %v3621_v58  ;;  %3472 = vmatprep.mubr.f32.mxu1 %v1574_v61 }
 0x1b5   : > { %3638 = vmatprep.subr.bf16.mxu1 %v3637_v7  ;;  %v2604_v60 = vand.u32 4294901760, %v2603_v57 }
 0x1bb   : > { %3473 = vmatmul.mubr.f32.vlgmr.msra.gmra.mrb[2].mxu1 %v1584_v62  ;;  %v3677_v62 = vpack.c.bf16 %v2629_v44, %v2622_v42 }
 0x1bc   : > { %3640 = vmatpush3.bf16.msra.mxu1 %v3637_v7  ;;  %3479 = vmatprep.mubr.f32.mxu1 %v4239_v52 }
 0x1bd   : > { %3642 = vmatprep.subr.bf16.mxu1 %v3621_v58 }
 0x1c3   : > { %3480 = vmatmul.mubr.f32.vlgmr.msra.gmra.mrb[2].mxu1 %v4241_v53 }
 0x1c4   : > { %3644 = vmatpush3.bf16.msra.mxu1 %v3621_v58  ;;  %3486 = vmatprep.mubr.f32.mxu1 %v4239_v52  ;;  %v3669_v52 = vpack.c.bf16 %v2537_v39, %v2534_v38  ;;  %v2613_v58 = vsub.f32 %v2611_v51, %v2612_v41 }
 0x1c5   : > { %3646 = vmatprep.subr.bf16.mxu1 %v3645_v22 }
 0x1c6   : > { %v2614_v61 = vand.u32 4294901760, %v2613_v58 }
 0x1cb   : > { %3487 = vmatmul.mubr.f32.vlgmr.msra.gmra.mrb[2].mxu1 %v4241_v53  ;;  %v2624_v53 = vsub.f32 %v2622_v42, %v2623_v48 }
 0x1cc   : > { %3648 = vmatpush3.bf16.msra.mxu1 %v3645_v22  ;;  %3493 = vmatprep.mubr.f32.mxu1 %v2090_v32 }
 0x1cd   : > { %3650 = vmatprep.subr.bf16.mxu1 %v3649_v31  ;;  %v2625_v55 = vand.u32 4294901760, %v2624_v53 }
 0x1cf   : > { %3494 = vmatmul.mubr.f32.vlgmr.msra.gmra.mrb[4].mxu1 %v2100_v33  ;;  %v3673_v59 = vpack.c.bf16 %v2632_v56, %v2625_v55 }
 0x1d0   : > { %3652 = vmatpush3.bf16.msra.mxu1 %v3649_v31  ;;  %3500 = vmatprep.mubr.f32.mxu1 %v4259_v16 }
 0x1d1   : > { %3654 = vmatprep.subr.bf16.mxu1 %v3653_v34 }
 0x1d7   : > { %3501 = vmatmul.mubr.f32.vlgmr.msra.gmra.mrb[4].mxu1 %v4262_v17 }
 0x1d8   : > { %3656 = vmatpush3.bf16.msra.mxu1 %v3653_v34  ;;  %3507 = vmatprep.mubr.f32.mxu1 %v2087_v20 }
 0x1d9   : > { %3658 = vmatprep.subr.bf16.mxu1 %v3645_v22 }
 0x1df   : > { %3508 = vmatmul.mubr.f32.vlgmr.msra.gmra.mrb[4].mxu1 %v2097_v21 }
 0x1e0   : > { %3660 = vmatpush3.bf16.msra.mxu1 %v3645_v22  ;;  %3514 = vmatprep.mubr.f32.mxu1 %v2088_v25 }
 0x1e1   : > { %3662 = vmatprep.subr.bf16.mxu1 %v3661_v35 }
 0x1e7   : > { %3515 = vmatmul.mubr.f32.vlgmr.msra.gmra.mrb[4].mxu1 %v2098_v26 }
 0x1e8   : > { %3664 = vmatpush3.bf16.msra.mxu1 %v3661_v35  ;;  %3521 = vmatprep.mubr.f32.mxu1 %v4259_v16 }
 0x1e9   : > { %3666 = vmatprep.subr.bf16.mxu1 %v3645_v22 }
 0x1ef   : > { %3522 = vmatmul.mubr.f32.vlgmr.msra.gmra.mrb[4].mxu1 %v4262_v17 }
 0x1f0   : > { %3668 = vmatpush3.bf16.msra.mxu1 %v3645_v22  ;;  %3528 = vmatprep.mubr.f32.mxu1 %v4259_v16 }
 0x1f1   : > { %3670 = vmatprep.subr.bf16.mxu1 %v3669_v52 }
 0x1f7   : > { %3529 = vmatmul.mubr.f32.vlgmr.msra.gmra.mrb[4].mxu1 %v4262_v17 }
 0x1f8   : > { %3672 = vmatpush3.bf16.msra.mxu1 %v3669_v52  ;;  %3535 = vmatprep.mubr.f32.mxu1 %v2604_v60 }
 0x1f9   : > { %3674 = vmatprep.subr.bf16.mxu1 %v3673_v59 }
 0x1fb   : > { %3536 = vmatmul.mubr.f32.vlgmr.msra.gmra.mrb[6].mxu1 %v2614_v61 }
 0x1fc   : > { %3676 = vmatpush3.bf16.msra.mxu1 %v3673_v59  ;;  %3542 = vmatprep.mubr.f32.mxu1 %v2600_v46 }
 0x1fd   : > { %3678 = vmatprep.subr.bf16.mxu1 %v3677_v62 }
 0x203   : > { %3543 = vmatmul.mubr.f32.vlgmr.msra.gmra.mrb[6].mxu1 %v2610_v47 }
 0x204   : > { %3680 = vmatpush3.bf16.msra.mxu1 %v3677_v62  ;;  %3549 = vmatprep.mubr.f32.mxu1 %v2601_v50 }
 0x205   : > { %3682 = vmatprep.subr.bf16.mxu1 %v3669_v52 }
 0x20b   : > { %3550 = vmatmul.mubr.f32.vlgmr.msra.gmra.mrb[6].mxu1 %v2611_v51 }
 0x20c   : > { %3684 = vmatpush3.bf16.msra.mxu1 %v3669_v52  ;;  %3556 = vmatprep.mubr.f32.mxu1 %v2602_v43 }
 0x20d   : > { %3686 = vmatprep.subr.bf16.mxu1 %v3685_v63 }
 0x213   : > { %3557 = vmatmul.mubr.f32.vlgmr.msra.gmra.mrb[6].mxu1 %v2612_v41 }
 0x214   : > { %3688 = vmatpush3.bf16.msra.mxu1 %v3685_v63  ;;  %3563 = vmatprep.mubr.f32.mxu1 %v2600_v46 }
 0x215   : > { %3690 = vmatprep.subr.bf16.mxu1 %v3669_v52 }
 0x21b   : > { %3564 = vmatmul.mubr.f32.vlgmr.msra.gmra.mrb[6].mxu1 %v2610_v47 }
 0x21c   : > { %3692 = vmatpush3.bf16.msra.mxu1 %v3669_v52  ;;  %3570 = vmatprep.mubr.f32.mxu1 %v2600_v46 }
 0x223   : > { %3571 = vmatmul.mubr.f32.vlgmr.msra.gmra.mrb[6].mxu1 %v2610_v47 }
 0x272   : > { %v3446_v0 = vpop.f32.mrb[0].mxu1 }
 0x273   : > { %1495 = vst.msk [vmem:[%s188_s11 + $0x8] sm:$0xff] %vm199_vm0, %v3446_v0  ;;  %v1484_v1 = vpop.f32.mrb[1].mxu1 }
 0x274   : > { %1494 = vst.msk [vmem:[%s188_s11] sm:$0xff] %vm199_vm0, %v1484_v1 }
 0x29e   : > { %v3488_v2 = vpop.f32.mrb[2].mxu1 }
 0x29f   : > { %3137 = vst.msk [vmem:[%s188_s11 + $0x18] sm:$0xff] %vm199_vm0, %v3488_v2  ;;  %v1997_v3 = vpop.f32.mrb[3].mxu1 }
 0x2a0   : > { %3136 = vst.msk [vmem:[%s188_s11 + $0x10] sm:$0xff] %vm199_vm0, %v1997_v3 }
 0x2ca   : > { %v3530_v4 = vpop.f32.mrb[4].mxu1 }
 0x2cb   : > { %3141 = vst.msk [vmem:[%s188_s11 + $0x28] sm:$0xff] %vm199_vm0, %v3530_v4  ;;  %v2511_v5 = vpop.f32.mrb[5].mxu1 }
 0x2cc   : > { %3140 = vst.msk [vmem:[%s188_s11 + $0x20] sm:$0xff] %vm199_vm0, %v2511_v5 }
 0x2f6   : > { %v3572_v6 = vpop.f32.mrb[6].mxu1 }
 0x2f7   : > { %3145 = vst.msk [vmem:[%s188_s11 + $0x38] sm:$0xff] %vm199_vm0, %v3572_v6  ;;  %v3025_v7 = vpop.f32.mrb[7].mxu1 }
 0x2f8   : > { %3144 = vst.msk [vmem:[%s188_s11 + $0x30] sm:$0xff] %vm199_vm0, %v3025_v7 }
 0x2f9   : > { %3866 = shalt.err (!%p3863_p2)
}
 0x2fa   : > { %s3867_s26 = scalar_lea.hbm %s4298_s17, 1024  ;;  %s3871_s29 = scalar_lea.hbm %s4347_s3, 2048 }
 0x2fb   : > { %p3868_p4 = scmp.ne.s32.totalorder %s4298_s17, %s3867_s26  ;;  %p3872_p9 = scmp.lt.u32.totalorder %s4298_s17, %s4347_s3 }
 0x2fc   : > { %p3873_p1 = scmp.lt.u32.totalorder %s3871_s29, %s3867_s26  ;;  %p3875_p6 = scmp.lt.u32.totalorder %s3867_s26, %s4298_s17 }
 0x2fd   : > { %p3869_p5 = pnand %p3868_p4, %p4354_p11 }
 0x2fe   : > { %p3874_p3 = por %p3873_p1, %p3872_p9 }
 0x2ff   : > { %p3870_p7 = pneg %p3869_p5 }
 0x300   : > { %p3876_p12 = por %p3875_p6, %p3874_p3 }
 0x302   : > { %p3877_p13 = pnand %p3876_p12, %p3870_p7 }
 0x304   : > { %3880 = shalt.err (!%p3877_p13)
}
 0x305   : > { %s3925_s10 = smov 128   ;;  %s3926_s11 = smov 8  }
 0x306   : > { %3775 = dma.vmem_to_hbm [thread:$0]  (%p4354_p11), %s4293_s4, 1024, %s4298_s17, %s3039_s19, %s3925_s10, %s3925_s10, %s3926_s11  }
 0x307 PF: > { %s3067_s6 = sand.u32 1, %s3907_s12   ;;  %p4355_p8 = scmp.ne.s32.totalorder %s4352_s25, 0 }
 0x308   : > { %p4356_p10 = scmp.ge.s32.totalorder %s3919_s15, 2  ;;  %s3068_s7 = scalar_lea.sflag [#allocation4], %s3067_s6 }
 0x30a   : > { %p3782_p0 = pnand %p4356_p10, %p4355_p8 }
 0x30c   : > { %3902 = dma.done.wait (!%p3782_p0), %s3068_s7, 1024  }
 0x30d   : > { %3904 = vsyncadd (!%p3782_p0), %s3068_s7, 4294966272  ;;  %p16_p2 = scmp.ge.s32.totalorder %s3972_s18, 4   ;;  %s4357_s12 = smov %s3911_s13 }
 0x30e   : > { %s4358_s13 = smov %s3915_s14  ;;  %s4359_s14 = smov %s3984_s21 }
 0x30f   : > { %s4360_s15 = smov %s3972_s18  ;;  %18 = sbr.rel (!%p16_p2) target bundleno = 5 (0x5), region = 83 }
 0x316   :  { %3073 = vsyncpa [#allocation3], 1 }
 0x317   :  { %3075 = vsyncpa [#allocation3 + $0x1], 1 }
 0x318   :  { %3076 = vsyncpa [#allocation4], 1 }
 0x319   :  { %3078 = vsyncpa [#allocation4 + $0x1], 1 }

</bundles_post_ra>
